<compile_context>
chip_gen: v5e
topology: v5e:2x2
jax: 0.10.0
libtpu: 0.0.40
codegen_flags: <defaults>
</compile_context>

<pallas_src>
import jax
import jax.numpy as jnp
from jax.experimental import pallas as pl
from jax.experimental.pallas import tpu as pltpu


def _round_up(x, m):
    return ((x + m - 1) // m) * m


def _plan_tiles(n):
    """(tm, tk): row tile / reduction tile for the N^2 aggregation matmul.

    256-aligned tiles fill the v6e/v7x 2x256x256 MXU; 512x1024 tiles for
    large graphs reach the ~85%-of-roofline regime while keeping the
    double-buffered working set well under v7x's 64 MiB VMEM.
    """
    if n <= 128:
        return 128, 128          # single lane-dense tile (last dim = 128)
    if n <= 1024:
        return 256, 256
    return 512, 1024


def _vmem_limit_bytes():
    """Per-generation VMEM budget: ~75% of capacity, capped at 100 MiB.

    v5e/v6e (128 MiB) -> ~96 MiB; v7x (64 MiB) -> 48 MiB.  Fallback 48 MiB
    is safe on every generation.
    """
    limit = 48 * 1024 * 1024
    try:
        cap = getattr(pltpu.get_tpu_info(), "vmem_capacity_bytes", None)
        if cap:
            limit = min((int(cap) * 3) // 4, 100 * 1024 * 1024)
    except Exception:
        pass
    return limit


def _aggregate_kernel(adj_ref, xw_ref, b_ref, o_ref):
    """Project-first path (XW hoisted): O[i] = bias + sum_k A[i,k] @ XW[k].

    Accumulates directly into the f32 output block (resident across k); the
    padded output rows hold the bias, which is sliced away by the wrapper.
    """
    k = pl.program_id(1)

    @pl.when(k == 0)
    def _init():
        o_ref[...] = jnp.broadcast_to(b_ref[...], o_ref.shape)

    a = adj_ref[...].astype(jnp.bfloat16)   # in-kernel cast: VPU filler under MXU
    o_ref[...] += jnp.dot(a, xw_ref[...], preferred_element_type=jnp.float32)


def _aggregate_project_kernel(adj_ref, x_ref, w_ref, b_ref, o_ref, acc_ref):
    """Aggregate-first path (d_out > d_in): acc = A @ X, then H = acc @ W + b."""
    k = pl.program_id(1)

    @pl.when(k == 0)
    def _init():
        acc_ref[...] = jnp.zeros_like(acc_ref)

    a = adj_ref[...].astype(jnp.bfloat16)
    acc_ref[...] += jnp.dot(a, x_ref[...], preferred_element_type=jnp.float32)

    @pl.when(k == pl.num_programs(1) - 1)
    def _finalize():
        h = jnp.dot(acc_ref[...].astype(jnp.bfloat16), w_ref[...],
                    preferred_element_type=jnp.float32)
        o_ref[...] = (h + b_ref[...]).astype(o_ref.dtype)


def gnn_layer_forward(adj, node_feat, weight, bias):
    """Pallas-backed GNN layer forward: (A @ X) @ W + b.

    adj:        [N, N]         dense, row-normalized adjacency ("graph")
    node_feat:  [N, D_in]
    weight:     [D_in, D_out]
    bias:       [1, D_out] or [D_out]
    returns:    [N, D_out]     float32

    Note: big operands run through the MXU in bf16 (f32 accumulation), so
    results differ from a pure-f32 reference by ~1e-2 relative; the two
    matmul-order branches are not bit-comparable to each other.
    """
    n, d_in = node_feat.shape
    d_out = weight.shape[1]
    bias = bias.reshape(1, d_out).astype(jnp.float32)

    # Matmul-order choice (trace time): project first when it shrinks the
    # feature dim carried through the dominant N^2 aggregation matmul.
    project_first = d_out <= d_in

    tm, tk = _plan_tiles(n)
    n_rows_pad = _round_up(n, tm)            # output-row axis
    n_red_pad = _round_up(n, tk)             # reduction axis
    d_in_pad = _round_up(d_in, 128)          # lane-dense feature dims
    d_out_pad = _round_up(d_out, 128)

    grid_i = n_rows_pad // tm
    grid_k = n_red_pad // tk
    grid = (grid_i, grid_k)

    # Adjacency stays f32 in HBM (cast to bf16 in-kernel); zero padding keeps
    # the math exact on the live [:n, :d_out] block.
    adj_p = jnp.pad(adj.astype(jnp.float32),
                    ((0, n_rows_pad - n), (0, n_red_pad - n)))
    b_p = jnp.pad(bias, ((0, 0), (0, d_out_pad - d_out)))

    vmem_limit = _vmem_limit_bytes()
    compiler_params = pltpu.CompilerParams(
        # Row-tile axis shards across TensorCores (v7x megacore); the
        # K reduction must stay "arbitrary".
        dimension_semantics=("parallel", "arbitrary"),
        vmem_limit_bytes=vmem_limit,
    )

    if project_first:
        # Hoisted projection: XW computed once, streamed in bf16 (d_out lanes).
        xw = jnp.dot(node_feat.astype(jnp.float32), weight.astype(jnp.float32),
                     preferred_element_type=jnp.float32)
        xw_p = jnp.pad(xw, ((0, n_red_pad - n),
                            (0, d_out_pad - d_out))).astype(jnp.bfloat16)

        flops = 2 * n_rows_pad * n_red_pad * d_out_pad
        bytes_accessed = (4 * n_rows_pad * n_red_pad             # A (f32)
                          + grid_i * 2 * n_red_pad * d_out_pad   # XW re-fetch
                          + 4 * d_out_pad                        # bias
                          + 4 * n_rows_pad * d_out_pad)          # output

        out = pl.pallas_call(
            _aggregate_kernel,
            out_shape=jax.ShapeDtypeStruct((n_rows_pad, d_out_pad),
                                           jnp.float32),
            grid_spec=pltpu.PrefetchScalarGridSpec(
                num_scalar_prefetch=0,
                grid=grid,
                in_specs=[
                    pl.BlockSpec((tm, tk), lambda i, k: (i, k)),           # A
                    pl.BlockSpec((tk, d_out_pad), lambda i, k: (k, 0)),    # XW
                    pl.BlockSpec((1, d_out_pad), lambda i, k: (0, 0)),     # b
                ],
                out_specs=pl.BlockSpec((tm, d_out_pad), lambda i, k: (i, 0)),
            ),
            compiler_params=compiler_params,
            cost_estimate=pl.CostEstimate(
                flops=flops, transcendentals=0,
                bytes_accessed=bytes_accessed),
        )(adj_p, xw_p, b_p)
    else:
        x_p = jnp.pad(node_feat,
                      ((0, n_red_pad - n),
                       (0, d_in_pad - d_in))).astype(jnp.bfloat16)
        w_p = jnp.pad(weight, ((0, d_in_pad - d_in),
                               (0, d_out_pad - d_out))).astype(jnp.bfloat16)

        flops = (2 * n_rows_pad * n_red_pad * d_in_pad
                 + 2 * n_rows_pad * d_in_pad * d_out_pad)
        bytes_accessed = (4 * n_rows_pad * n_red_pad
                          + grid_i * 2 * n_red_pad * d_in_pad
                          + grid_i * 2 * d_in_pad * d_out_pad
                          + 4 * d_out_pad
                          + 4 * n_rows_pad * d_out_pad)

        out = pl.pallas_call(
            _aggregate_project_kernel,
            out_shape=jax.ShapeDtypeStruct((n_rows_pad, d_out_pad),
                                           jnp.float32),
            grid_spec=pltpu.PrefetchScalarGridSpec(
                num_scalar_prefetch=0,
                grid=grid,
                in_specs=[
                    pl.BlockSpec((tm, tk), lambda i, k: (i, k)),              # A
                    pl.BlockSpec((tk, d_in_pad), lambda i, k: (k, 0)),        # X
                    pl.BlockSpec((d_in_pad, d_out_pad), lambda i, k: (0, 0)), # W
                    pl.BlockSpec((1, d_out_pad), lambda i, k: (0, 0)),        # b
                ],
                out_specs=pl.BlockSpec((tm, d_out_pad), lambda i, k: (i, 0)),
                scratch_shapes=[pltpu.VMEM((tm, d_in_pad), jnp.float32)],
            ),
            compiler_params=compiler_params,
            cost_estimate=pl.CostEstimate(
                flops=flops, transcendentals=0,
                bytes_accessed=bytes_accessed),
        )(adj_p, x_p, w_p, b_p)

    return out[:n, :d_out]


if __name__ == "__main__":
    key = jax.random.PRNGKey(0)
    (k_adj, k_x, k_w1, k_b1, k_w2, k_b2, k_adj3, k_x3) = jax.random.split(key, 8)

    fwd = jax.jit(gnn_layer_forward)

    # --- Case 1: contracting layer (d_out < d_in) -> project-first path. ---
    N, D_IN, D_OUT = 256, 128, 64
    adj_raw = (jax.random.uniform(k_adj, (N, N)) > 0.7).astype(jnp.float32)
    adj_raw = adj_raw + jnp.eye(N, dtype=jnp.float32)            # self loops
    adj = adj_raw / jnp.sum(adj_raw, axis=-1, keepdims=True)     # mean aggregation
    node_feat = jax.random.normal(k_x, (N, D_IN), dtype=jnp.float32)
    w1 = jax.random.normal(k_w1, (D_IN, D_OUT), dtype=jnp.float32) * 0.1
    b1 = jax.random.normal(k_b1, (1, D_OUT), dtype=jnp.float32) * 0.01

    out1 = jax.block_until_ready(fwd(adj, node_feat, w1, b1))
    ref1 = (adj @ node_feat) @ w1 + b1
    assert out1.shape == (N, D_OUT)
    assert jnp.allclose(out1, ref1, atol=3e-2, rtol=3e-2), \
        float(jnp.max(jnp.abs(out1 - ref1)))

    # --- Case 2: expanding layer (d_out > d_in) -> aggregate-first path. ---
    w2 = jax.random.normal(k_w2, (D_IN, 2 * D_IN), dtype=jnp.float32) * 0.1
    b2 = jax.random.normal(k_b2, (1, 2 * D_IN), dtype=jnp.float32) * 0.01

    out2 = jax.block_until_ready(fwd(adj, node_feat, w2, b2))
    ref2 = (adj @ node_feat) @ w2 + b2
    assert out2.shape == (N, 2 * D_IN)
    assert jnp.allclose(out2, ref2, atol=3e-2, rtol=3e-2), \
        float(jnp.max(jnp.abs(out2 - ref2)))

    # --- Case 3: ragged shapes (exercise row / reduction / feature padding). ---
    N3, D_IN3, D_OUT3 = 200, 96, 48
    adj3_raw = (jax.random.uniform(k_adj3, (N3, N3)) > 0.7).astype(jnp.float32)
    adj3_raw = adj3_raw + jnp.eye(N3, dtype=jnp.float32)
    adj3 = adj3_raw / jnp.sum(adj3_raw, axis=-1, keepdims=True)
    x3 = jax.random.normal(k_x3, (N3, D_IN3), dtype=jnp.float32)
    w3 = jax.random.normal(k_w1, (D_IN3, D_OUT3), dtype=jnp.float32) * 0.1
    b3 = jax.random.normal(k_b1, (1, D_OUT3), dtype=jnp.float32) * 0.01

    out3 = jax.block_until_ready(fwd(adj3, x3, w3, b3))
    ref3 = (adj3 @ x3) @ w3 + b3
    assert out3.shape == (N3, D_OUT3)
    assert jnp.allclose(out3, ref3, atol=3e-2, rtol=3e-2), \
        float(jnp.max(jnp.abs(out3 - ref3)))

    print("KERNEL_OK")
</pallas_src>

<mosaic_0001>
module attributes {stable_mosaic.version = 11 : i64} {
  func.func @_aggregate_kernel(%arg0: i32, %arg1: i32, %arg2: memref<256x256xf32, #tpu.memory_space<vmem>>, %arg3: memref<256x128xbf16, #tpu.memory_space<vmem>>, %arg4: memref<1x128xf32, #tpu.memory_space<vmem>>, %arg5: memref<256x128xf32, #tpu.memory_space<vmem>>) attributes {dimension_semantics = [#tpu.dimension_semantics<parallel>, #tpu.dimension_semantics<arbitrary>], iteration_bounds = array<i64: 1, 1>, scalar_prefetch = 0 : i64, scratch_operands = 0 : i64, tpu.core_type = #tpu.core_type<tc>, window_params = [{transform_indices = @transform_0, window_bounds = array<i64: 256, 256>}, {transform_indices = @transform_1, window_bounds = array<i64: 256, 128>}, {pipeline_mode = #tpu.pipeline_mode<synchronous>, transform_indices = @transform_2, window_bounds = array<i64: 1, 128>}, {transform_indices = @transform_3, window_bounds = array<i64: 256, 128>}]} {
    %c0_i32 = arith.constant 0 : i32
    %0 = arith.cmpi eq, %arg1, %c0_i32 : i32
    %1 = arith.extui %0 : i1 to i32
    %c0_i32_0 = arith.constant 0 : i32
    %2 = arith.cmpi ne, %1, %c0_i32_0 : i32
    scf.if %2 {
      %c0_8 = arith.constant 0 : index
      %c0_9 = arith.constant 0 : index
      %10 = vector.load %arg4[%c0_8, %c0_9] : memref<1x128xf32, #tpu.memory_space<vmem>>, vector<1x128xf32>
      %11 = vector.shape_cast %10 : vector<1x128xf32> to vector<1x128xf32>
      %12 = vector.broadcast %11 : vector<1x128xf32> to vector<256x128xf32>
      %c0_10 = arith.constant 0 : index
      %c0_11 = arith.constant 0 : index
      %13 = vector.load %arg5[%c0_10, %c0_11] : memref<256x128xf32, #tpu.memory_space<vmem>>, vector<256x128xf32>
      tpu.vector_store %arg5[%c0_10, %c0_11], %12 {strides = array<i32>} : memref<256x128xf32, #tpu.memory_space<vmem>>, vector<256x128xf32>,
    } else {
    }
    %c0 = arith.constant 0 : index
    %c0_1 = arith.constant 0 : index
    %3 = vector.load %arg2[%c0, %c0_1] : memref<256x256xf32, #tpu.memory_space<vmem>>, vector<256x256xf32>
    %4 = arith.truncf %3 : vector<256x256xf32> to vector<256x256xbf16>
    %c0_2 = arith.constant 0 : index
    %c0_3 = arith.constant 0 : index
    %5 = vector.load %arg5[%c0_2, %c0_3] : memref<256x128xf32, #tpu.memory_space<vmem>>, vector<256x128xf32>
    %c0_4 = arith.constant 0 : index
    %c0_5 = arith.constant 0 : index
    %6 = vector.load %arg3[%c0_4, %c0_5] : memref<256x128xbf16, #tpu.memory_space<vmem>>, vector<256x128xbf16>
    %cst = arith.constant dense<0.000000e+00> : vector<256x128xf32>
    %7 = tpu.matmul %4, %6, %cst {dimension_numbers = #tpu.dot_dimension_numbers<[1], [0], [0], [1], [0, 0, 1, 1], [], []>} : vector<256x256xbf16>, vector<256x128xbf16>, vector<256x128xf32> -> vector<256x128xf32>
    %8 = arith.addf %5, %7 : vector<256x128xf32>
    %c0_6 = arith.constant 0 : index
    %c0_7 = arith.constant 0 : index
    %9 = vector.load %arg5[%c0_6, %c0_7] : memref<256x128xf32, #tpu.memory_space<vmem>>, vector<256x128xf32>
    tpu.vector_store %arg5[%c0_6, %c0_7], %8 {strides = array<i32>} : memref<256x128xf32, #tpu.memory_space<vmem>>, vector<256x128xf32>,
    return
  }
  func.func @transform_0(%arg0: i32, %arg1: i32) -> (i32, i32) {
    %c0_i32 = arith.constant 0 : i32
    return %arg0, %arg1 : i32, i32
  }
  func.func @transform_1(%arg0: i32, %arg1: i32) -> (i32, i32) {
    %c0_i32 = arith.constant 0 : i32
    %c0_i32_0 = arith.constant 0 : i32
    return %arg1, %c0_i32 : i32, i32
  }
  func.func @transform_2(%arg0: i32, %arg1: i32) -> (i32, i32) {
    %c0_i32 = arith.constant 0 : i32
    %c0_i32_0 = arith.constant 0 : i32
    %c0_i32_1 = arith.constant 0 : i32
    return %c0_i32, %c0_i32_0 : i32, i32
  }
  func.func @transform_3(%arg0: i32, %arg1: i32) -> (i32, i32) {
    %c0_i32 = arith.constant 0 : i32
    %c0_i32_0 = arith.constant 0 : i32
    return %arg0, %c0_i32 : i32, i32
  }
}

</mosaic_0001>

<bundles_post_ra>
// kernel: gnn_layer_forward.1
= control target key start
LH: loop header
LB: loop body
LE: loop exit
PB: predicated region body
PF: predicated region fallthrough
CT: control target
= control target key end

     0   :  { %s1046_s1 = inlined_call_operand.vmem [shape: bf16[256,128], index: 1, kind: input, shape index: {}]   ;;  %s1047_s0 = inlined_call_operand.vmem [shape: f32[256,256], index: 0, kind: input, shape index: {}]   ;;  %s1048_s2 = inlined_call_operand.vmem [shape: f32[1,128], index: 2, kind: input, shape index: {}]   ;;  %s1049_s3 = inlined_call_operand.vmem [shape: f32[256,128], index: 3, kind: output, shape index: {}]  }
   0x1   :  { %v627_v0 = vld [vmem:[%s1046_s1 + $0x38] sm:$0xff]  ;;  %v626_v2 = vld [vmem:[%s1046_s1 + $0x30] sm:$0xff]  ;;  %v625_v4 = vld [vmem:[%s1046_s1 + $0x28] sm:$0xff] }
   0x2   :  { %v635_v1 = vld [vmem:[%s1046_s1 + $0x78] sm:$0xff]  ;;  %310 = vmatpush.bf16.msra.mxu0 %v627_v0  ;;  %636 = vmatpush.bf16.msra.mxu2 %v627_v0  ;;  %v634_v3 = vld [vmem:[%s1046_s1 + $0x70] sm:$0xff]  ;;  %v633_v5 = vld [vmem:[%s1046_s1 + $0x68] sm:$0xff] }
   0x3   :  { %399 = vmatpush.bf16.msra.mxu1 %v635_v1  ;;  %644 = vmatpush.bf16.msra.mxu3 %v635_v1  ;;  %v624_v6 = vld [vmem:[%s1046_s1 + $0x20] sm:$0xff]  ;;  %v623_v8 = vld [vmem:[%s1046_s1 + $0x18] sm:$0xff]  ;;  %v622_v10 = vld [vmem:[%s1046_s1 + $0x10] sm:$0xff] }
   0x4   :  { %v632_v7 = vld [vmem:[%s1046_s1 + $0x60] sm:$0xff]  ;;  %v631_v9 = vld [vmem:[%s1046_s1 + $0x58] sm:$0xff]  ;;  %v630_v11 = vld [vmem:[%s1046_s1 + $0x50] sm:$0xff] }
   0x5   :  { %v621_v12 = vld [vmem:[%s1046_s1 + $0x8] sm:$0xff]  ;;  %v620_v14 = vld [vmem:[%s1046_s1] sm:$0xff]  ;;  %v56_v17 = vld [vmem:[%s1047_s0 + $0x10] sm:$0xff] }
   0x6   :  { %311 = vmatpush.bf16.msra.mxu0 %v626_v2  ;;  %637 = vmatpush.bf16.msra.mxu2 %v626_v2  ;;  %v629_v13 = vld [vmem:[%s1046_s1 + $0x48] sm:$0xff]  ;;  %v628_v15 = vld [vmem:[%s1046_s1 + $0x40] sm:$0xff]  ;;  %v88_v19 = vld [vmem:[%s1047_s0 + $0x110] sm:$0xff] }
   0x7   :  { %400 = vmatpush.bf16.msra.mxu1 %v634_v3  ;;  %645 = vmatpush.bf16.msra.mxu3 %v634_v3  ;;  %v54_v16 = vld [vmem:[%s1047_s0] sm:$0xff]  ;;  %v55_v20 = vld [vmem:[%s1047_s0 + $0x8] sm:$0xff]  ;;  %v57_v21 = vld [vmem:[%s1047_s0 + $0x18] sm:$0xff] }
   0x8   :  { %v86_v18 = vld [vmem:[%s1047_s0 + $0x100] sm:$0xff]  ;;  %v87_v22 = vld [vmem:[%s1047_s0 + $0x108] sm:$0xff]  ;;  %v89_v23 = vld [vmem:[%s1047_s0 + $0x118] sm:$0xff]  ;;  %v118_v24 = vpack.c.bf16 %v56_v17, %v54_v16  ;;  %v119_v26 = vpack.c.bf16 %v57_v21, %v55_v20 }
   0x9   :  { %v134_v25 = vpack.c.bf16 %v88_v19, %v86_v18  ;;  %v135_v27 = vpack.c.bf16 %v89_v23, %v87_v22  ;;  %v58_v28 = vld [vmem:[%s1047_s0 + $0x20] sm:$0xff]  ;;  %v60_v29 = vld [vmem:[%s1047_s0 + $0x30] sm:$0xff]  ;;  %v59_v32 = vld [vmem:[%s1047_s0 + $0x28] sm:$0xff] }
   0xa   :  { %312 = vmatpush.bf16.msra.mxu0 %v625_v4  ;;  %638 = vmatpush.bf16.msra.mxu2 %v625_v4  ;;  %v90_v30 = vld [vmem:[%s1047_s0 + $0x120] sm:$0xff]  ;;  %v92_v31 = vld [vmem:[%s1047_s0 + $0x130] sm:$0xff]  ;;  %v61_v33 = vld [vmem:[%s1047_s0 + $0x38] sm:$0xff]  ;;  %v120_v36 = vpack.c.bf16 %v60_v29, %v58_v28 }
   0xb   :  { %401 = vmatpush.bf16.msra.mxu1 %v633_v5  ;;  %646 = vmatpush.bf16.msra.mxu3 %v633_v5  ;;  %v91_v34 = vld [vmem:[%s1047_s0 + $0x128] sm:$0xff]  ;;  %v93_v35 = vld [vmem:[%s1047_s0 + $0x138] sm:$0xff]  ;;  %v136_v37 = vpack.c.bf16 %v92_v31, %v90_v30  ;;  %v121_v38 = vpack.c.bf16 %v61_v33, %v59_v32  ;;  %v62_v40 = vld [vmem:[%s1047_s0 + $0x40] sm:$0xff] }
   0xc   :  { %v137_v39 = vpack.c.bf16 %v93_v35, %v91_v34  ;;  %v64_v41 = vld [vmem:[%s1047_s0 + $0x50] sm:$0xff]  ;;  %v94_v42 = vld [vmem:[%s1047_s0 + $0x140] sm:$0xff]  ;;  %v63_v44 = vld [vmem:[%s1047_s0 + $0x48] sm:$0xff] }
   0xd   :  { %v96_v43 = vld [vmem:[%s1047_s0 + $0x150] sm:$0xff]  ;;  %v65_v45 = vld [vmem:[%s1047_s0 + $0x58] sm:$0xff]  ;;  %v95_v46 = vld [vmem:[%s1047_s0 + $0x148] sm:$0xff]  ;;  %v122_v48 = vpack.c.bf16 %v64_v41, %v62_v40 }
   0xe   :  { %313 = vmatpush.bf16.msra.mxu0 %v624_v6  ;;  %639 = vmatpush.bf16.msra.mxu2 %v624_v6  ;;  %v97_v47 = vld [vmem:[%s1047_s0 + $0x158] sm:$0xff]  ;;  %v138_v49 = vpack.c.bf16 %v96_v43, %v94_v42  ;;  %v123_v50 = vpack.c.bf16 %v65_v45, %v63_v44  ;;  %v66_v52 = vld [vmem:[%s1047_s0 + $0x60] sm:$0xff]  ;;  %v68_v53 = vld [vmem:[%s1047_s0 + $0x70] sm:$0xff] }
   0xf   :  { %402 = vmatpush.bf16.msra.mxu1 %v632_v7  ;;  %647 = vmatpush.bf16.msra.mxu3 %v632_v7  ;;  %v139_v51 = vpack.c.bf16 %v97_v47, %v95_v46  ;;  %v98_v54 = vld [vmem:[%s1047_s0 + $0x160] sm:$0xff]  ;;  %v100_v55 = vld [vmem:[%s1047_s0 + $0x170] sm:$0xff]  ;;  %v67_v56 = vld [vmem:[%s1047_s0 + $0x68] sm:$0xff]  ;;  %v124_v60 = vpack.c.bf16 %v68_v53, %v66_v52 }
  0x10   :  { %v69_v57 = vld [vmem:[%s1047_s0 + $0x78] sm:$0xff]  ;;  %v99_v58 = vld [vmem:[%s1047_s0 + $0x168] sm:$0xff]  ;;  %v140_v61 = vpack.c.bf16 %v100_v55, %v98_v54  ;;  %v70_v0 = vld [vmem:[%s1047_s0 + $0x80] sm:$0xff] }
  0x11   :  { %v101_v59 = vld [vmem:[%s1047_s0 + $0x178] sm:$0xff]  ;;  %v125_v62 = vpack.c.bf16 %v69_v57, %v67_v56  ;;  %v72_v1 = vld [vmem:[%s1047_s0 + $0x90] sm:$0xff]  ;;  %v102_v2 = vld [vmem:[%s1047_s0 + $0x180] sm:$0xff] }
  0x12   :  { %314 = vmatpush.bf16.msra.mxu0 %v623_v8  ;;  %640 = vmatpush.bf16.msra.mxu2 %v623_v8  ;;  %v141_v63 = vpack.c.bf16 %v101_v59, %v99_v58  ;;  %v104_v3 = vld [vmem:[%s1047_s0 + $0x190] sm:$0xff]  ;;  %v71_v4 = vld [vmem:[%s1047_s0 + $0x88] sm:$0xff]  ;;  %v73_v5 = vld [vmem:[%s1047_s0 + $0x98] sm:$0xff]  ;;  %v126_v8 = vpack.c.bf16 %v72_v1, %v70_v0 }
  0x13   :  { %403 = vmatpush.bf16.msra.mxu1 %v631_v9  ;;  %648 = vmatpush.bf16.msra.mxu3 %v631_v9  ;;  %v103_v6 = vld [vmem:[%s1047_s0 + $0x188] sm:$0xff]  ;;  %v105_v7 = vld [vmem:[%s1047_s0 + $0x198] sm:$0xff]  ;;  %v142_v9 = vpack.c.bf16 %v104_v3, %v102_v2 }
  0x14   :  { %v75_v16 = vld [vmem:[%s1047_s0 + $0xa8] sm:$0xff]  ;;  %v77_v17 = vld [vmem:[%s1047_s0 + $0xb8] sm:$0xff] }
  0x15   :  { %v107_v18 = vld [vmem:[%s1047_s0 + $0x1a8] sm:$0xff]  ;;  %v109_v19 = vld [vmem:[%s1047_s0 + $0x1b8] sm:$0xff]  ;;  %v129_v22 = vpack.c.bf16 %v77_v17, %v75_v16 }
  0x16   :  { %315 = vmatpush.bf16.msra.mxu0 %v622_v10  ;;  %641 = vmatpush.bf16.msra.mxu2 %v622_v10  ;;  %v127_v10 = vpack.c.bf16 %v73_v5, %v71_v4  ;;  %v145_v23 = vpack.c.bf16 %v109_v19, %v107_v18  ;;  %v79_v28 = vld [vmem:[%s1047_s0 + $0xc8] sm:$0xff]  ;;  %v81_v29 = vld [vmem:[%s1047_s0 + $0xd8] sm:$0xff] }
  0x17   :  { %404 = vmatpush.bf16.msra.mxu1 %v630_v11  ;;  %649 = vmatpush.bf16.msra.mxu3 %v630_v11  ;;  %v143_v11 = vpack.c.bf16 %v105_v7, %v103_v6  ;;  %v111_v30 = vld [vmem:[%s1047_s0 + $0x1c8] sm:$0xff]  ;;  %v113_v31 = vld [vmem:[%s1047_s0 + $0x1d8] sm:$0xff]  ;;  %v131_v34 = vpack.c.bf16 %v81_v29, %v79_v28 }
  0x18   :  { %v147_v35 = vpack.c.bf16 %v113_v31, %v111_v30  ;;  %v83_v40 = vld [vmem:[%s1047_s0 + $0xe8] sm:$0xff]  ;;  %v85_v41 = vld [vmem:[%s1047_s0 + $0xf8] sm:$0xff] }
  0x19   :  { %v115_v42 = vld [vmem:[%s1047_s0 + $0x1e8] sm:$0xff]  ;;  %v117_v43 = vld [vmem:[%s1047_s0 + $0x1f8] sm:$0xff]  ;;  %v133_v46 = vpack.c.bf16 %v85_v41, %v83_v40 }
  0x1a   :  { %316 = vmatpush.bf16.msra.mxu0 %v621_v12  ;;  %642 = vmatpush.bf16.msra.mxu2 %v621_v12  ;;  %v74_v12 = vld [vmem:[%s1047_s0 + $0xa0] sm:$0xff]  ;;  %v149_v47 = vpack.c.bf16 %v117_v43, %v115_v42 }
  0x1b   :  { %405 = vmatpush.bf16.msra.mxu1 %v629_v13  ;;  %650 = vmatpush.bf16.msra.mxu3 %v629_v13  ;;  %v76_v13 = vld [vmem:[%s1047_s0 + $0xb0] sm:$0xff] }
  0x1c   :  { %v128_v20 = vpack.c.bf16 %v76_v13, %v74_v12 }
  0x1e   :  { %317 = vmatpush.bf16.msra.mxu0 %v620_v14  ;;  %643 = vmatpush.bf16.msra.mxu2 %v620_v14  ;;  %v106_v14 = vld [vmem:[%s1047_s0 + $0x1a0] sm:$0xff] }
  0x1f   :  { %406 = vmatpush.bf16.msra.mxu1 %v628_v15  ;;  %651 = vmatpush.bf16.msra.mxu3 %v628_v15  ;;  %v108_v15 = vld [vmem:[%s1047_s0 + $0x1b0] sm:$0xff] }
  0x20   :  { %v144_v21 = vpack.c.bf16 %v108_v15, %v106_v14 }
  0x21   :  { %318 = vmatmul.bf16.vlgmr.msra.gmra.mxu0 %v118_v24  ;;  %358 = vmatmul.bf16.vlgmr.msra.gmra.mxu2 %v134_v25  ;;  %v78_v24 = vld [vmem:[%s1047_s0 + $0xc0] sm:$0xff]  ;;  %v80_v25 = vld [vmem:[%s1047_s0 + $0xd0] sm:$0xff] }
  0x22   :  { %407 = vmatmul.bf16.vlgmr.msra.gmra.mxu1 %v119_v26  ;;  %447 = vmatmul.bf16.vlgmr.msra.gmra.mxu3 %v135_v27  ;;  %v110_v26 = vld [vmem:[%s1047_s0 + $0x1c0] sm:$0xff]  ;;  %v112_v27 = vld [vmem:[%s1047_s0 + $0x1d0] sm:$0xff]  ;;  %v130_v32 = vpack.c.bf16 %v80_v25, %v78_v24 }
  0x23   :  { %v146_v33 = vpack.c.bf16 %v112_v27, %v110_v26 }
  0x31   :  { %323 = vmatmul.bf16.gmra.mxu0 %v120_v36  ;;  %363 = vmatmul.bf16.gmra.mxu2 %v136_v37  ;;  %v82_v36 = vld [vmem:[%s1047_s0 + $0xe0] sm:$0xff]  ;;  %v84_v37 = vld [vmem:[%s1047_s0 + $0xf0] sm:$0xff] }
  0x32   :  { %412 = vmatmul.bf16.gmra.mxu1 %v121_v38  ;;  %452 = vmatmul.bf16.gmra.mxu3 %v137_v39  ;;  %v114_v38 = vld [vmem:[%s1047_s0 + $0x1e0] sm:$0xff]  ;;  %v116_v39 = vld [vmem:[%s1047_s0 + $0x1f0] sm:$0xff]  ;;  %v132_v44 = vpack.c.bf16 %v84_v37, %v82_v36 }
  0x33   :  { %v148_v45 = vpack.c.bf16 %v116_v39, %v114_v38 }
  0x41   :  { %328 = vmatmul.bf16.gmra.mxu0 %v122_v48  ;;  %368 = vmatmul.bf16.gmra.mxu2 %v138_v49  ;;  %v916_v49 = vld [vmem:[%s1048_s2] ss:$0 sm:$0xff] }
  0x42   :  { %417 = vmatmul.bf16.gmra.mxu1 %v123_v50  ;;  %457 = vmatmul.bf16.gmra.mxu3 %v139_v51 }
  0x51   :  { %333 = vmatmul.bf16.gmra.mxu0 %v124_v60  ;;  %373 = vmatmul.bf16.gmra.mxu2 %v140_v61 }
  0x52   :  { %422 = vmatmul.bf16.gmra.mxu1 %v125_v62  ;;  %462 = vmatmul.bf16.gmra.mxu3 %v141_v63 }
  0x61   :  { %338 = vmatmul.bf16.gmra.mxu0 %v126_v8  ;;  %378 = vmatmul.bf16.gmra.mxu2 %v142_v9 }
  0x62   :  { %427 = vmatmul.bf16.gmra.mxu1 %v127_v10  ;;  %467 = vmatmul.bf16.gmra.mxu3 %v143_v11 }
  0x71   :  { %343 = vmatmul.bf16.gmra.mxu0 %v128_v20  ;;  %383 = vmatmul.bf16.gmra.mxu2 %v144_v21 }
  0x72   :  { %432 = vmatmul.bf16.gmra.mxu1 %v129_v22  ;;  %472 = vmatmul.bf16.gmra.mxu3 %v145_v23 }
  0x81   :  { %348 = vmatmul.bf16.gmra.mxu0 %v130_v32  ;;  %388 = vmatmul.bf16.gmra.mxu2 %v146_v33 }
  0x82   :  { %437 = vmatmul.bf16.gmra.mxu1 %v131_v34  ;;  %477 = vmatmul.bf16.gmra.mxu3 %v147_v35 }
  0x91   :  { %353 = vmatmul.bf16.gmra.mxu0 %v132_v44  ;;  %393 = vmatmul.bf16.gmra.mxu2 %v148_v45 }
  0x92   :  { %442 = vmatmul.bf16.gmra.mxu1 %v133_v46  ;;  %482 = vmatmul.bf16.gmra.mxu3 %v149_v47 }
  0x9e   :  { %v319_v48 = vpop.f32.mrf.mxu0 }
  0x9f   :  { %v408_v50 = vpop.f32.mrf.mxu1 }
  0xa0   :  { %v409_v51 = vadd.f32 %v408_v50, %v319_v48 }
  0xa2   :  { %v488_v52 = vadd.f32 %v916_v49, %v409_v51 }
  0xa4   :  { %520 = vst [vmem:[%s1049_s3] sm:$0xff] %v488_v52  ;;  %v359_v53 = vpop.f32.mrf.mxu2 }
  0xa5   :  { %v448_v54 = vpop.f32.mrf.mxu3 }
  0xa6   :  { %v449_v55 = vadd.f32 %v448_v54, %v359_v53  ;;  %v321_v56 = vpop.f32.mrf.mxu0 }
  0xa7   :  { %v410_v57 = vpop.f32.mrf.mxu1 }
  0xa8   :  { %v504_v58 = vadd.f32 %v916_v49, %v449_v55  ;;  %v411_v59 = vadd.f32 %v410_v57, %v321_v56 }
  0xaa   :  { %536 = vst [vmem:[%s1049_s3 + $0x80] sm:$0xff] %v504_v58  ;;  %v489_v60 = vadd.f32 %v916_v49, %v411_v59 }
  0xac   :  { %521 = vst [vmem:[%s1049_s3 + $0x8] sm:$0xff] %v489_v60  ;;  %v361_v61 = vpop.f32.mrf.mxu2 }
  0xad   :  { %v450_v62 = vpop.f32.mrf.mxu3 }
  0xae   :  { %v451_v63 = vadd.f32 %v450_v62, %v361_v61  ;;  %v324_v0 = vpop.f32.mrf.mxu0 }
  0xaf   :  { %v413_v1 = vpop.f32.mrf.mxu1 }
  0xb0   :  { %v505_v2 = vadd.f32 %v916_v49, %v451_v63  ;;  %v414_v3 = vadd.f32 %v413_v1, %v324_v0 }
  0xb2   :  { %537 = vst [vmem:[%s1049_s3 + $0x88] sm:$0xff] %v505_v2  ;;  %v490_v4 = vadd.f32 %v916_v49, %v414_v3 }
  0xb4   :  { %522 = vst [vmem:[%s1049_s3 + $0x10] sm:$0xff] %v490_v4  ;;  %v364_v5 = vpop.f32.mrf.mxu2 }
  0xb5   :  { %v453_v6 = vpop.f32.mrf.mxu3 }
  0xb6   :  { %v454_v7 = vadd.f32 %v453_v6, %v364_v5  ;;  %v326_v8 = vpop.f32.mrf.mxu0 }
  0xb7   :  { %v415_v9 = vpop.f32.mrf.mxu1 }
  0xb8   :  { %v506_v10 = vadd.f32 %v916_v49, %v454_v7  ;;  %v416_v11 = vadd.f32 %v415_v9, %v326_v8 }
  0xba   :  { %538 = vst [vmem:[%s1049_s3 + $0x90] sm:$0xff] %v506_v10  ;;  %v491_v12 = vadd.f32 %v916_v49, %v416_v11 }
  0xbc   :  { %523 = vst [vmem:[%s1049_s3 + $0x18] sm:$0xff] %v491_v12  ;;  %v366_v13 = vpop.f32.mrf.mxu2 }
  0xbd   :  { %v455_v14 = vpop.f32.mrf.mxu3 }
  0xbe   :  { %v456_v15 = vadd.f32 %v455_v14, %v366_v13  ;;  %v329_v16 = vpop.f32.mrf.mxu0 }
  0xbf   :  { %v418_v17 = vpop.f32.mrf.mxu1 }
  0xc0   :  { %v507_v18 = vadd.f32 %v916_v49, %v456_v15  ;;  %v419_v19 = vadd.f32 %v418_v17, %v329_v16 }
  0xc2   :  { %539 = vst [vmem:[%s1049_s3 + $0x98] sm:$0xff] %v507_v18  ;;  %v492_v20 = vadd.f32 %v916_v49, %v419_v19 }
  0xc4   :  { %524 = vst [vmem:[%s1049_s3 + $0x20] sm:$0xff] %v492_v20  ;;  %v369_v21 = vpop.f32.mrf.mxu2 }
  0xc5   :  { %v458_v22 = vpop.f32.mrf.mxu3 }
  0xc6   :  { %v459_v23 = vadd.f32 %v458_v22, %v369_v21  ;;  %v331_v24 = vpop.f32.mrf.mxu0 }
  0xc7   :  { %v420_v25 = vpop.f32.mrf.mxu1 }
  0xc8   :  { %v508_v26 = vadd.f32 %v916_v49, %v459_v23  ;;  %v421_v27 = vadd.f32 %v420_v25, %v331_v24 }
  0xca   :  { %540 = vst [vmem:[%s1049_s3 + $0xa0] sm:$0xff] %v508_v26  ;;  %v493_v28 = vadd.f32 %v916_v49, %v421_v27 }
  0xcc   :  { %525 = vst [vmem:[%s1049_s3 + $0x28] sm:$0xff] %v493_v28  ;;  %v371_v29 = vpop.f32.mrf.mxu2 }
  0xcd   :  { %v460_v30 = vpop.f32.mrf.mxu3 }
  0xce   :  { %v461_v31 = vadd.f32 %v460_v30, %v371_v29  ;;  %v334_v32 = vpop.f32.mrf.mxu0 }
  0xcf   :  { %v423_v33 = vpop.f32.mrf.mxu1 }
  0xd0   :  { %v509_v34 = vadd.f32 %v916_v49, %v461_v31  ;;  %v424_v35 = vadd.f32 %v423_v33, %v334_v32 }
  0xd2   :  { %541 = vst [vmem:[%s1049_s3 + $0xa8] sm:$0xff] %v509_v34  ;;  %v494_v36 = vadd.f32 %v916_v49, %v424_v35 }
  0xd4   :  { %526 = vst [vmem:[%s1049_s3 + $0x30] sm:$0xff] %v494_v36  ;;  %v374_v37 = vpop.f32.mrf.mxu2 }
  0xd5   :  { %v463_v38 = vpop.f32.mrf.mxu3 }
  0xd6   :  { %v464_v39 = vadd.f32 %v463_v38, %v374_v37  ;;  %v336_v40 = vpop.f32.mrf.mxu0 }
  0xd7   :  { %v425_v41 = vpop.f32.mrf.mxu1 }
  0xd8   :  { %v510_v42 = vadd.f32 %v916_v49, %v464_v39  ;;  %v426_v43 = vadd.f32 %v425_v41, %v336_v40 }
  0xda   :  { %542 = vst [vmem:[%s1049_s3 + $0xb0] sm:$0xff] %v510_v42  ;;  %v495_v44 = vadd.f32 %v916_v49, %v426_v43 }
  0xdc   :  { %527 = vst [vmem:[%s1049_s3 + $0x38] sm:$0xff] %v495_v44  ;;  %v376_v45 = vpop.f32.mrf.mxu2 }
  0xdd   :  { %v465_v46 = vpop.f32.mrf.mxu3 }
  0xde   :  { %v466_v47 = vadd.f32 %v465_v46, %v376_v45  ;;  %v339_v48 = vpop.f32.mrf.mxu0 }
  0xdf   :  { %v428_v50 = vpop.f32.mrf.mxu1 }
  0xe0   :  { %v511_v51 = vadd.f32 %v916_v49, %v466_v47  ;;  %v429_v52 = vadd.f32 %v428_v50, %v339_v48 }
  0xe2   :  { %543 = vst [vmem:[%s1049_s3 + $0xb8] sm:$0xff] %v511_v51  ;;  %v496_v53 = vadd.f32 %v916_v49, %v429_v52 }
  0xe4   :  { %528 = vst [vmem:[%s1049_s3 + $0x40] sm:$0xff] %v496_v53  ;;  %v379_v54 = vpop.f32.mrf.mxu2 }
  0xe5   :  { %v468_v55 = vpop.f32.mrf.mxu3 }
  0xe6   :  { %v469_v56 = vadd.f32 %v468_v55, %v379_v54  ;;  %v341_v57 = vpop.f32.mrf.mxu0 }
  0xe7   :  { %v430_v58 = vpop.f32.mrf.mxu1 }
  0xe8   :  { %v512_v59 = vadd.f32 %v916_v49, %v469_v56  ;;  %v431_v60 = vadd.f32 %v430_v58, %v341_v57 }
  0xea   :  { %544 = vst [vmem:[%s1049_s3 + $0xc0] sm:$0xff] %v512_v59  ;;  %v497_v61 = vadd.f32 %v916_v49, %v431_v60 }
  0xec   :  { %529 = vst [vmem:[%s1049_s3 + $0x48] sm:$0xff] %v497_v61  ;;  %v381_v62 = vpop.f32.mrf.mxu2 }
  0xed   :  { %v470_v63 = vpop.f32.mrf.mxu3 }
  0xee   :  { %v471_v0 = vadd.f32 %v470_v63, %v381_v62  ;;  %v344_v1 = vpop.f32.mrf.mxu0 }
  0xef   :  { %v433_v2 = vpop.f32.mrf.mxu1 }
  0xf0   :  { %v513_v3 = vadd.f32 %v916_v49, %v471_v0  ;;  %v434_v4 = vadd.f32 %v433_v2, %v344_v1 }
  0xf2   :  { %545 = vst [vmem:[%s1049_s3 + $0xc8] sm:$0xff] %v513_v3  ;;  %v498_v5 = vadd.f32 %v916_v49, %v434_v4 }
  0xf4   :  { %530 = vst [vmem:[%s1049_s3 + $0x50] sm:$0xff] %v498_v5  ;;  %v384_v6 = vpop.f32.mrf.mxu2 }
  0xf5   :  { %v473_v7 = vpop.f32.mrf.mxu3 }
  0xf6   :  { %v474_v8 = vadd.f32 %v473_v7, %v384_v6  ;;  %v346_v9 = vpop.f32.mrf.mxu0 }
  0xf7   :  { %v435_v10 = vpop.f32.mrf.mxu1 }
  0xf8   :  { %v514_v11 = vadd.f32 %v916_v49, %v474_v8  ;;  %v436_v12 = vadd.f32 %v435_v10, %v346_v9 }
  0xfa   :  { %546 = vst [vmem:[%s1049_s3 + $0xd0] sm:$0xff] %v514_v11  ;;  %v499_v13 = vadd.f32 %v916_v49, %v436_v12 }
  0xfc   :  { %531 = vst [vmem:[%s1049_s3 + $0x58] sm:$0xff] %v499_v13  ;;  %v386_v14 = vpop.f32.mrf.mxu2 }
  0xfd   :  { %v475_v15 = vpop.f32.mrf.mxu3 }
  0xfe   :  { %v476_v16 = vadd.f32 %v475_v15, %v386_v14  ;;  %v349_v17 = vpop.f32.mrf.mxu0 }
  0xff   :  { %v438_v18 = vpop.f32.mrf.mxu1 }
 0x100   :  { %v515_v19 = vadd.f32 %v916_v49, %v476_v16  ;;  %v439_v20 = vadd.f32 %v438_v18, %v349_v17 }
 0x102   :  { %547 = vst [vmem:[%s1049_s3 + $0xd8] sm:$0xff] %v515_v19  ;;  %v500_v21 = vadd.f32 %v916_v49, %v439_v20 }
 0x104   :  { %532 = vst [vmem:[%s1049_s3 + $0x60] sm:$0xff] %v500_v21  ;;  %v389_v22 = vpop.f32.mrf.mxu2 }
 0x105   :  { %v478_v23 = vpop.f32.mrf.mxu3 }
 0x106   :  { %v479_v24 = vadd.f32 %v478_v23, %v389_v22  ;;  %v351_v25 = vpop.f32.mrf.mxu0 }
 0x107   :  { %v440_v26 = vpop.f32.mrf.mxu1 }
 0x108   :  { %v516_v27 = vadd.f32 %v916_v49, %v479_v24  ;;  %v441_v28 = vadd.f32 %v440_v26, %v351_v25 }
 0x10a   :  { %548 = vst [vmem:[%s1049_s3 + $0xe0] sm:$0xff] %v516_v27  ;;  %v501_v29 = vadd.f32 %v916_v49, %v441_v28 }
 0x10c   :  { %533 = vst [vmem:[%s1049_s3 + $0x68] sm:$0xff] %v501_v29  ;;  %v391_v30 = vpop.f32.mrf.mxu2 }
 0x10d   :  { %v480_v31 = vpop.f32.mrf.mxu3 }
 0x10e   :  { %v481_v32 = vadd.f32 %v480_v31, %v391_v30  ;;  %v354_v33 = vpop.f32.mrf.mxu0 }
 0x10f   :  { %v443_v34 = vpop.f32.mrf.mxu1 }
 0x110   :  { %v517_v35 = vadd.f32 %v916_v49, %v481_v32  ;;  %v444_v36 = vadd.f32 %v443_v34, %v354_v33 }
 0x112   :  { %549 = vst [vmem:[%s1049_s3 + $0xe8] sm:$0xff] %v517_v35  ;;  %v502_v37 = vadd.f32 %v916_v49, %v444_v36 }
 0x114   :  { %534 = vst [vmem:[%s1049_s3 + $0x70] sm:$0xff] %v502_v37  ;;  %v394_v38 = vpop.f32.mrf.mxu2 }
 0x115   :  { %v483_v39 = vpop.f32.mrf.mxu3 }
 0x116   :  { %v484_v40 = vadd.f32 %v483_v39, %v394_v38  ;;  %v356_v41 = vpop.f32.mrf.mxu0 }
 0x117   :  { %v445_v42 = vpop.f32.mrf.mxu1 }
 0x118   :  { %v518_v43 = vadd.f32 %v916_v49, %v484_v40  ;;  %v446_v44 = vadd.f32 %v445_v42, %v356_v41 }
 0x11a   :  { %550 = vst [vmem:[%s1049_s3 + $0xf0] sm:$0xff] %v518_v43  ;;  %v503_v45 = vadd.f32 %v916_v49, %v446_v44 }
 0x11c   :  { %535 = vst [vmem:[%s1049_s3 + $0x78] sm:$0xff] %v503_v45  ;;  %v396_v46 = vpop.f32.mrf.mxu2 }
 0x11d   :  { %v485_v47 = vpop.f32.mrf.mxu3 }
 0x11e   :  { %v486_v48 = vadd.f32 %v485_v47, %v396_v46 }
 0x120   :  { %v519_v50 = vadd.f32 %v916_v49, %v486_v48 }
 0x122   :  { %551 = vst [vmem:[%s1049_s3 + $0xf8] sm:$0xff] %v519_v50 }

</bundles_post_ra>
